<compile_context>
chip_gen: v6e
topology: v6e:2x2x1
jax: 0.10.0
libtpu: 0.0.40
codegen_flags: <defaults>
</compile_context>

<pallas_src>
import jax
import jax.numpy as jnp
from jax.experimental import pallas as pl
from jax.experimental.pallas import tpu as pltpu

_MIB = 1024 * 1024


def _round_up(x: int, m: int) -> int:
    return ((x + m - 1) // m) * m


def _min_sublane(dtype) -> int:
    # Sub-32-bit dtypes pack along sublanes: (8,128) f32, (16,128) bf16,
    # (32,128) int8/fp8.
    return {4: 8, 2: 16, 1: 32}.get(jnp.dtype(dtype).itemsize, 8)


def _pick_tile(dim: int, max_tile: int, align: int):
    """Pick a tile for one dimension.

    Returns (tile, divides_exactly).  Preference order:
      1. full extent (dim <= max_tile): always a legal block, no waste;
      2. the largest multiple of `align` <= max_tile that divides dim exactly
         (no pad waste, no masked edges);
      3. the largest aligned tile, with a cdiv grid and a masked edge block.
    """
    if dim <= max_tile:
        return dim, True
    top = max(align, (max_tile // align) * align)
    t = top
    while t >= align:
        if dim % t == 0:
            return t, True
        t -= align
    return top, False


# ----------------------------- kernel bodies ------------------------------


def _matmul_kernel_single_k(a_ref, b_ref, o_ref):
    # Entire K fits in one block: no accumulator, no control flow.
    o_ref[...] = jnp.dot(
        a_ref[...], b_ref[...], preferred_element_type=jnp.float32
    ).astype(o_ref.dtype)


def _matmul_kernel_acc_in_out(a_ref, b_ref, o_ref):
    # f32 output: the output block stays resident across the K ("arbitrary")
    # axis and doubles as the accumulator.  First K step writes, rest add.
    k = pl.program_id(2)
    p = jnp.dot(a_ref[...], b_ref[...], preferred_element_type=jnp.float32)

    @pl.when(k == 0)
    def _():
        o_ref[...] = p

    @pl.when(k > 0)
    def _():
        o_ref[...] += p


def _matmul_kernel_acc_scratch(a_ref, b_ref, o_ref, acc_ref):
    # Non-f32 output: accumulate in an f32 VMEM scratch, cast once at the end.
    k = pl.program_id(2)
    p = jnp.dot(a_ref[...], b_ref[...], preferred_element_type=jnp.float32)

    @pl.when(k == 0)
    def _():
        acc_ref[...] = p

    @pl.when(k > 0)
    def _():
        acc_ref[...] += p

    @pl.when(k == pl.num_programs(2) - 1)
    def _():
        o_ref[...] = acc_ref[...].astype(o_ref.dtype)


# ------------------------------- wrapper -----------------------------------


def single_op_model_forward(a: jax.Array, b: jax.Array) -> jax.Array:
    """Pallas equivalent of SingleOpModel(torch.matmul, {}).forward(a, b)."""
    M, K = a.shape
    K2, N = b.shape
    assert K == K2, "inner dims must match"

    out_dtype = jnp.result_type(a.dtype, b.dtype)
    a_isz = jnp.dtype(a.dtype).itemsize
    b_isz = jnp.dtype(b.dtype).itemsize
    o_isz = jnp.dtype(out_dtype).itemsize

    # Tile ceilings: wider output tiles for narrow dtypes (higher arithmetic
    # intensity on v6e/v7x), conservative for f32 so the footprint stays well
    # inside every generation's scoped-VMEM budget (incl. v7x: 64 MiB phys).
    narrow = max(a_isz, b_isz) <= 2
    tm_max = 1024 if narrow else 512
    tn_max = 1024
    tk_max = 512

    m_align = max(_min_sublane(a.dtype), _min_sublane(out_dtype))
    tm, _ = _pick_tile(M, tm_max, m_align)   # M remainder -> masked edge block
    tn, _ = _pick_tile(N, tn_max, 128)       # N remainder -> masked edge block
    tk, k_divides = _pick_tile(K, tk_max, 128)

    # Only K is ever zero-padded (garbage in K would corrupt the accumulation);
    # M/N remainders never trigger an extra HBM pad/slice pass.
    a_p, b_p, K_p = a, b, K
    if not k_divides:
        K_p = _round_up(K, tk)
        a_p = jnp.pad(a, ((0, 0), (0, K_p - K)))
        b_p = jnp.pad(b, ((0, K_p - K), (0, 0)))

    gm = pl.cdiv(M, tm)
    gn = pl.cdiv(N, tn)
    gk = K_p // tk

    # Real HBM traffic including re-reads: A is streamed once per N tile,
    # B once per M tile.
    cost = pl.CostEstimate(
        flops=2 * M * N * K_p,
        bytes_accessed=gn * M * K_p * a_isz + gm * K_p * N * b_isz + M * N * o_isz,
        transcendentals=0,
    )

    use_scratch_acc = (gk > 1) and (out_dtype != jnp.float32)
    vmem_bytes = (
        2 * (tm * tk * a_isz + tk * tn * b_isz)   # double-buffered inputs
        + 2 * tm * tn * o_isz                     # output block
        + (tm * tn * 4 if use_scratch_acc else 0)  # f32 accumulator
    )
    vmem_limit = min(48 * _MIB, max(32 * _MIB, (vmem_bytes * 3) // 2))

    if gk == 1:
        grid = (gm, gn)
        kernel = _matmul_kernel_single_k
        in_specs = [
            pl.BlockSpec((tm, tk), lambda i, j: (i, 0)),
            pl.BlockSpec((tk, tn), lambda i, j: (0, j)),
        ]
        out_spec = pl.BlockSpec((tm, tn), lambda i, j: (i, j))
        scratch = []
        dims = ("parallel", "parallel")
    else:
        grid = (gm, gn, gk)
        in_specs = [
            pl.BlockSpec((tm, tk), lambda i, j, k: (i, k)),
            pl.BlockSpec((tk, tn), lambda i, j, k: (k, j)),
        ]
        out_spec = pl.BlockSpec((tm, tn), lambda i, j, k: (i, j))
        dims = ("parallel", "parallel", "arbitrary")
        if use_scratch_acc:
            kernel = _matmul_kernel_acc_scratch
            scratch = [pltpu.VMEM((tm, tn), jnp.float32)]
        else:
            kernel = _matmul_kernel_acc_in_out
            scratch = []

    return pl.pallas_call(
        kernel,
        out_shape=jax.ShapeDtypeStruct((M, N), out_dtype),
        grid_spec=pltpu.PrefetchScalarGridSpec(
            num_scalar_prefetch=0,
            grid=grid,
            in_specs=in_specs,
            out_specs=out_spec,
            scratch_shapes=scratch,
        ),
        compiler_params=pltpu.CompilerParams(
            dimension_semantics=dims,
            vmem_limit_bytes=int(vmem_limit),
        ),
        cost_estimate=cost,
    )(a_p, b_p)


if __name__ == "__main__":
    key = jax.random.PRNGKey(0)
    k1, k2 = jax.random.split(key)

    # Small shapes consistent with the op-consistency test: seq=8, hidden=32.
    a = jax.random.normal(k1, (8, 32), dtype=jnp.float32)
    b = jax.random.normal(k2, (32, 32), dtype=jnp.float32)

    out = jax.block_until_ready(single_op_model_forward(a, b))
    ref = jnp.dot(a, b)
    assert out.shape == (8, 32)
    assert out.dtype == ref.dtype
    assert jnp.allclose(out, ref, atol=1e-5, rtol=1e-5), "mismatch vs reference"

    # Larger shape exercising the multi-K accumulate-into-output path with a
    # non-power-of-two N (640) that is now a single full-extent tile (no pad).
    k3, k4 = jax.random.split(k2)
    a_big = jax.random.normal(k3, (1024, 1536), dtype=jnp.float32)
    b_big = jax.random.normal(k4, (1536, 640), dtype=jnp.float32)
    out_big = jax.block_until_ready(single_op_model_forward(a_big, b_big))
    ref_big = jnp.dot(a_big, b_big)
    assert jnp.allclose(out_big, ref_big, atol=1e-3, rtol=1e-3), "big mismatch"

    print("KERNEL_OK")
</pallas_src>

<mosaic_0001>
module attributes {stable_mosaic.version = 11 : i64} {
  func.func @_matmul_kernel_single_k(%arg0: i32, %arg1: i32, %arg2: memref<8x32xf32, #tpu.memory_space<vmem>>, %arg3: memref<32x32xf32, #tpu.memory_space<vmem>>, %arg4: memref<8x32xf32, #tpu.memory_space<vmem>>) attributes {dimension_semantics = [#tpu.dimension_semantics<parallel>, #tpu.dimension_semantics<parallel>], iteration_bounds = array<i64: 1, 1>, scalar_prefetch = 0 : i64, scratch_operands = 0 : i64, tpu.core_type = #tpu.core_type<tc>, window_params = [{transform_indices = @transform_0, window_bounds = array<i64: 8, 32>}, {transform_indices = @transform_1, window_bounds = array<i64: 32, 32>}, {transform_indices = @transform_2, window_bounds = array<i64: 8, 32>}]} {
    %c0 = arith.constant 0 : index
    %c0_0 = arith.constant 0 : index
    %0 = vector.load %arg2[%c0, %c0_0] : memref<8x32xf32, #tpu.memory_space<vmem>>, vector<8x32xf32>
    %c0_1 = arith.constant 0 : index
    %c0_2 = arith.constant 0 : index
    %1 = vector.load %arg3[%c0_1, %c0_2] : memref<32x32xf32, #tpu.memory_space<vmem>>, vector<32x32xf32>
    %cst = arith.constant dense<0.000000e+00> : vector<8x32xf32>
    %2 = tpu.matmul %0, %1, %cst {dimension_numbers = #tpu.dot_dimension_numbers<[1], [0], [0], [1], [0, 0, 1, 1], [], []>} : vector<8x32xf32>, vector<32x32xf32>, vector<8x32xf32> -> vector<8x32xf32>
    %c0_3 = arith.constant 0 : index
    %c0_4 = arith.constant 0 : index
    %3 = vector.load %arg4[%c0_3, %c0_4] : memref<8x32xf32, #tpu.memory_space<vmem>>, vector<8x32xf32>
    tpu.vector_store %arg4[%c0_3, %c0_4], %2 {strides = array<i32>} : memref<8x32xf32, #tpu.memory_space<vmem>>, vector<8x32xf32>,
    return
  }
  func.func @transform_0(%arg0: i32, %arg1: i32) -> (i32, i32) {
    %c0_i32 = arith.constant 0 : i32
    %c0_i32_0 = arith.constant 0 : i32
    return %arg0, %c0_i32 : i32, i32
  }
  func.func @transform_1(%arg0: i32, %arg1: i32) -> (i32, i32) {
    %c0_i32 = arith.constant 0 : i32
    %c0_i32_0 = arith.constant 0 : i32
    return %c0_i32, %arg1 : i32, i32
  }
  func.func @transform_2(%arg0: i32, %arg1: i32) -> (i32, i32) {
    %c0_i32 = arith.constant 0 : i32
    return %arg0, %arg1 : i32, i32
  }
}

</mosaic_0001>

<bundles_post_ra>
// kernel: tpu_custom_call.1
= control target key start
LH: loop header
LB: loop body
LE: loop exit
PB: predicated region body
PF: predicated region fallthrough
CT: control target
= control target key end

     0   :  { %7 = vsyncpa [#allocation3], 0  ;;  %s255_s0 = inlined_call_operand.hbm [shape: f32[8,32], index: 0, kind: input, shape index: {}]   ;;  %s256_s1 = inlined_call_operand.hbm [shape: f32[32,32], index: 1, kind: input, shape index: {}]   ;;  %s257_s2 = inlined_call_operand.hbm [shape: f32[8,32], index: 2, kind: output, shape index: {}]  }
   0x1   :  { %8 = vsyncpa [#allocation6], 0 }
   0x2   :  { %9 = vsyncpa [#allocation4], 0  ;;  %s224_s9 = smov [#allocation2]   ;;  %s225_s11 = smov [#allocation5]  }
   0x3   :  { %s16_s10 = sshll.u32 %s224_s9, 4  ;;  %s25_s12 = sshll.u32 %s225_s11, 4  ;;  %s17_s10 = int_to_ptr.vmem [resolvable:$true] %s16_s10  ;;  %s26_s12 = int_to_ptr.vmem [resolvable:$true] %s25_s12 }
   0x4   :  { %s166_s13 = scalar_lea.vmem %s17_s10, 128  ;;  %p171_p1 = scmp.lt.s32.totalorder %s17_s10, %s17_s10 }
   0x5   :  { %p167_p0 = scmp.ne.s32.totalorder %s17_s10, %s166_s13  ;;  %p172_p2 = scmp.lt.s32.totalorder %s166_s13, %s166_s13 }
   0x7   :  { %p173_p3 = por %p172_p2, %p171_p1 }
   0x9   :  { %p174_p4 = pnand %p173_p3, %p167_p0 }
   0xb   :  { %177 = shalt.err (!%p174_p4)
}
   0xc   :  { %19 = dma.hbm_to_vmem [thread:$0]  %s255_s0, 128, %s17_s10, [#allocation3]  }
   0xd   :  { %s186_s16 = scalar_lea.vmem %s26_s12, 512  ;;  %p191_p6 = scmp.lt.s32.totalorder %s26_s12, %s26_s12 }
   0xe   :  { %p187_p5 = scmp.ne.s32.totalorder %s26_s12, %s186_s16  ;;  %p192_p7 = scmp.lt.s32.totalorder %s186_s16, %s186_s16 }
  0x10   :  { %p193_p8 = por %p192_p7, %p191_p6 }
  0x12   :  { %p194_p9 = pnand %p193_p8, %p187_p5 }
  0x14   :  { %197 = shalt.err (!%p194_p9)
}
  0x15   :  { %s226_s17 = smov 128   ;;  %s227_s18 = smov 8  }
  0x16   :  { %31 = dma.hbm_to_vmem [thread:$0]  %s256_s1, 512, %s26_s12, [#allocation6], %s226_s17, %s226_s17, %s227_s18  }
  0x17   :  { %218 = dma.done.wait [#allocation3], 128  }
  0x18   :  { %219 = vsyncadd [#allocation3], 4294967168 }
  0x19   :  { %220 = dma.done.wait [#allocation6], 512  }
  0x1a   :  { %221 = vsyncadd [#allocation6], 4294966784  ;;  %v228_v0 = vmov 0.0   ;;  %vm229_vm0 = vmmov 0   ;;  %v42_v1 = vld [vmem:[#allocation5 + $0x18] sm:$0xff]  ;;  %v41_v2 = vld [vmem:[#allocation5 + $0x10] sm:$0xff] }
  0x1b   :  { %140 = vmatprep.subr.mxu0 %v228_v0  ;;  %148 = vmatprep.mubr.msk.f32.mxu0 %vm229_vm0, %v228_v0  ;;  %v40_v3 = vld [vmem:[#allocation5 + $0x8] sm:$0xff]  ;;  %v39_v4 = vld [vmem:[#allocation5] sm:$0xff]  ;;  %v38_v5 = vld [vmem:[#allocation2] sm:$0xff]  ;;  %vm43_vm1 = vcmask 261120   ;;  %s230_s0 = smov [#allocation7]  }
  0x1c   :  { %141 = vmatpush3.msra.mxu0 %v42_v1  ;;  %s124_s1 = sshll.u32 %s230_s0, 4  ;;  %s125_s1 = int_to_ptr.vmem [resolvable:$true] %s124_s1 }
  0x1d   :  { %142 = vmatprep.subr.mxu0 %v228_v0  ;;  %s198_s21 = scalar_lea.vmem %s125_s1, 128  ;;  %p203_p11 = scmp.lt.s32.totalorder %s125_s1, %s125_s1 }
  0x1e   :  { %143 = vmatpush3.msra.mxu0 %v41_v2  ;;  %p199_p10 = scmp.ne.s32.totalorder %s125_s1, %s198_s21  ;;  %p204_p12 = scmp.lt.s32.totalorder %s198_s21, %s198_s21 }
  0x1f   :  { %144 = vmatprep.subr.mxu0 %v228_v0 }
  0x20   :  { %145 = vmatpush3.msra.mxu0 %v40_v3  ;;  %p205_p13 = por %p204_p12, %p203_p11 }
  0x21   :  { %146 = vmatprep.subr.mxu0 %v228_v0 }
  0x22   :  { %147 = vmatpush3.msra.mxu0 %v39_v4  ;;  %p206_p0 = pnand %p205_p13, %p199_p10 }
  0x23   :  { %149 = vmatmul.mubr.msk.f32.vlgmr.msra.gmra.mxu0 %vm43_vm1, %v38_v5 }
  0xe3   :  { %v113_v6 = vpop.f32.mrf.mxu0 }
  0xe4   :  { %117 = vst.msk [vmem:[#allocation7] sm:$0xff] %vm43_vm1, %v113_v6 }
  0xe5   :  { %v150_v7 = vpop.f32.mrf.mxu0 }
  0xe6   :  { %209 = shalt.err (!%p206_p0)
}
  0xe7   :  { %127 = dma.vmem_to_hbm [thread:$0]  %s125_s1, 128, %s257_s2, [#allocation4]  }
  0xe8   :  { %222 = dma.done.wait [#allocation4], 128  }
  0xe9   :  { %223 = vsyncadd [#allocation4], 4294967168 }
  0xea   :  { %131 = vsyncpa [#allocation3], 1 }
  0xeb   :  { %132 = vsyncpa [#allocation6], 1 }
  0xec   :  { %133 = vsyncpa [#allocation4], 1 }

</bundles_post_ra>
